<compile_context>
chip_gen: v7x
topology: tpu7x:2x2x1
jax: 0.10.0
libtpu: 0.0.40
codegen_flags: <defaults>
</compile_context>

<pallas_src>
import functools

import jax
import jax.numpy as jnp
from jax import lax
from jax.experimental import pallas as pl
from jax.experimental.pallas import tpu as pltpu


# ----------------------------------------------------------------------------
# Pallas kernel: fused bidirectional GRU recurrence + last-hidden extraction.
# ----------------------------------------------------------------------------
def _bigru_recurrence_kernel(len_ref, gi_rz_ref, gi_n_ref, w_rz_ref, w_n_ref,
                             bhhn_ref, out_ref, *, hidden: int):
    """Fused bi-directional GRU recurrence on one batch tile.

    len_ref   : (TB, 1)     int32  sequence lengths
    gi_rz_ref : (T, TB, 4H) bf16   input projections (biases folded) for the
                                   r/z gates, layout [r_f, r_b, z_f, z_b];
                                   backward columns already time-reversed.
    gi_n_ref  : (T, TB, 2H) bf16   same for the n gate, layout [n_f, n_b].
    w_rz_ref  : (2H, 4H)    bf16   block-diagonal recurrent weights (r/z).
    w_n_ref   : (2H, 2H)    bf16   block-diagonal recurrent weights (n).
    bhhn_ref  : (1, 2H)     f32    recurrent bias of the n gate [fwd | bwd]
                                   (cannot be folded: PyTorch scales it by r).
    out_ref   : (TB, 2H)    f32    [h_fwd | h_bwd] last hidden states.
    """
    H = hidden
    H2 = 2 * H
    T = gi_rz_ref.shape[0]
    TB = out_ref.shape[0]

    # Loop-invariant values hoisted ONCE (JAX does not CSE broadcasts).
    w_rz = w_rz_ref[...]                                      # (2H, 4H) bf16
    w_n = w_n_ref[...]                                        # (2H, 2H) bf16
    bhh_n = jnp.broadcast_to(bhhn_ref[...], (TB, H2))         # (TB, 2H) f32
    len_b = jnp.broadcast_to(len_ref[...], (TB, H2))          # (TB, 2H) i32
    col = lax.broadcasted_iota(jnp.int32, (TB, H2), 1)
    is_fwd = (col < H).astype(jnp.int32)                      # 1 fwd / 0 bwd
    t_off = (1 - is_fwd) * (T - 1)                            # 0 fwd, T-1 bwd
    t_sgn = 2 * is_fwd - 1                                    # +1 fwd, -1 bwd

    def step(t, h):
        gi_rz_t = gi_rz_ref[t]                                # (TB, 4H) bf16
        gi_n_t = gi_n_ref[t]                                  # (TB, 2H) bf16
        # bf16 operands into the MXU, f32 accumulation, f32 gate math.
        h_bf = h.astype(jnp.bfloat16)
        gh_rz = jnp.dot(h_bf, w_rz, preferred_element_type=jnp.float32)
        gh_n = jnp.dot(h_bf, w_n, preferred_element_type=jnp.float32)
        rz = jax.nn.sigmoid(gi_rz_t.astype(jnp.float32) + gh_rz)  # (TB, 4H)
        r = rz[:, :H2]
        z = rz[:, H2:]
        n = jnp.tanh(gi_n_t.astype(jnp.float32) + r * (gh_n + bhh_n))
        h_new = (1.0 - z) * n + z * h
        # packed-sequence semantics: effective time t (fwd) / T-1-t (bwd) must
        # be < length, otherwise h stays frozen (h0 = 0).
        mask = (t_off + t_sgn * t) < len_b                    # (TB, 2H) bool
        return jnp.where(mask, h_new, h)

    h0 = jnp.zeros((TB, H2), jnp.float32)
    h = lax.fori_loop(0, T, step, h0, unroll=True)
    out_ref[...] = h


# ----------------------------------------------------------------------------
# Wrapper: embedding lookup + hoisted input-projection GEMM + pallas_call.
# ----------------------------------------------------------------------------
def _interleave(a_fwd, a_bwd, H, gates):
    """From per-direction [r, z, n]-ordered arrays, build the direction-
    interleaved layout over the requested gate indices, e.g. gates=(0, 1)
    -> [r_f, r_b, z_f, z_b]."""
    pieces = []
    for g in gates:
        pieces.append(a_fwd[..., g * H:(g + 1) * H])
        pieces.append(a_bwd[..., g * H:(g + 1) * H])
    return jnp.concatenate(pieces, axis=-1)


def _tpu_vmem_capacity_bytes():
    try:
        return int(pltpu.get_tpu_info().vmem_capacity_bytes)
    except Exception:
        return 64 * 1024 * 1024       # conservative default (v7x per-TC VMEM)


def _pick_batch_tile(B, T, H, gi_budget_bytes):
    """Batch tile: multiple of 8, fits the bf16 gi double-buffer budget, and
    keeps >= 2 grid steps when B > 8 (dual-TC sharding / DMA overlap)."""
    def gi_bytes(tb):
        return 2 * T * tb * 6 * H * 2        # double-buffered bf16 rz+n tiles

    if B <= 8:
        return B
    tb = max(8, (B // 2) // 8 * 8)           # >= 2 grid steps
    while tb > 8 and gi_bytes(tb) > gi_budget_bytes:
        tb -= 8
    return tb


def char_bigru_forward(tokens, seq_lengths, params):
    """tokens: (B, T) int32; seq_lengths: (B,) int32 (descending, as the
    PyTorch module requires). Returns (B, hidden_dim) float32."""
    B, T = tokens.shape
    E = params["embedding"].shape[1]
    H = params["whh_f"].shape[0]
    H2, H3, H4, H6 = 2 * H, 3 * H, 4 * H, 6 * H

    # Embedding lookup + dropout (identity in eval mode).
    # TODO(synk): training-mode dropout (stochastic mask) not reproduced.
    emb = jnp.take(params["embedding"], tokens, axis=0).astype(jnp.float32)
    x = jnp.transpose(emb, (1, 0, 2))                          # (T, B, E)

    # ---- Hoisted input projection: ONE (T*B, E) @ (E, 6H) GEMM. -------------
    # r/z gates: fold bih + bhh; n gate: fold only bih (its bhh term is scaled
    # by r inside the recurrence).
    bias_f = jnp.concatenate(
        [params["bih_f"][:, :H2] + params["bhh_f"][:, :H2],
         params["bih_f"][:, H2:]], axis=-1)                    # (1, 3H)
    bias_b = jnp.concatenate(
        [params["bih_b"][:, :H2] + params["bhh_b"][:, :H2],
         params["bih_b"][:, H2:]], axis=-1)                    # (1, 3H)
    wih_cat = jnp.concatenate([params["wih_f"], params["wih_b"]], axis=1)
    bias_cat = jnp.concatenate([bias_f, bias_b], axis=1)       # (1, 6H)

    gi = (x.reshape(T * B, E) @ wih_cat + bias_cat).reshape(T, B, H6)
    gi_f = gi[..., :H3]
    gi_b = gi[::-1, :, H3:]                 # time-reverse backward direction

    # Direction-interleaved, gate-grouped layouts, stored bf16 (HBM traffic).
    gi_rz = _interleave(gi_f, gi_b, H, (0, 1)).astype(jnp.bfloat16)  # (T,B,4H)
    gi_n = _interleave(gi_f, gi_b, H, (2,)).astype(jnp.bfloat16)     # (T,B,2H)

    # ---- Block-diagonal recurrent weights (rows 0:H act on h_fwd). ----------
    zeros_h = jnp.zeros((H, H3), jnp.float32)
    w_rz = jnp.concatenate(
        [_interleave(params["whh_f"], zeros_h, H, (0, 1)),
         _interleave(zeros_h, params["whh_b"], H, (0, 1))],
        axis=0).astype(jnp.bfloat16)                           # (2H, 4H)
    w_n = jnp.concatenate(
        [_interleave(params["whh_f"], zeros_h, H, (2,)),
         _interleave(zeros_h, params["whh_b"], H, (2,))],
        axis=0).astype(jnp.bfloat16)                           # (2H, 2H)
    bhh_n = jnp.concatenate(
        [params["bhh_f"][:, H2:], params["bhh_b"][:, H2:]], axis=-1)  # (1,2H)

    lengths2d = seq_lengths.reshape(B, 1).astype(jnp.int32)

    # ---- Generation-aware tiling / VMEM budget. ------------------------------
    vmem_cap = _tpu_vmem_capacity_bytes()
    gi_budget = min(32 * 1024 * 1024, vmem_cap // 4)
    TB = _pick_batch_tile(B, T, H, gi_budget)
    num_tiles = -(-B // TB)
    PB = num_tiles * TB
    if PB != B:                             # pad batch; padded rows have len 0
        pad = PB - B
        gi_rz = jnp.pad(gi_rz, ((0, 0), (0, pad), (0, 0)))
        gi_n = jnp.pad(gi_n, ((0, 0), (0, pad), (0, 0)))
        lengths2d = jnp.pad(lengths2d, ((0, pad), (0, 0)))

    vmem_est = (2 * T * TB * H6 * 2          # double-buffered bf16 gi tiles
                + 2 * TB * 4                 # lengths
                + 2 * TB * H2 * 4            # output
                + 2 * (H2 * H4 + H2 * H2) * 2 + 2 * H2 * 4   # weights / n-bias
                + 16 * TB * H2 * 4)          # in-kernel live-value slack
    vmem_limit = int(max(16 * 1024 * 1024,
                         min(vmem_cap * 7 // 8, 2 * vmem_est)))

    kernel = functools.partial(_bigru_recurrence_kernel, hidden=H)

    out = pl.pallas_call(
        kernel,
        out_shape=jax.ShapeDtypeStruct((PB, H2), jnp.float32),
        grid=(num_tiles,),
        in_specs=[
            pl.BlockSpec((TB, 1), lambda i: (i, 0)),           # lengths
            pl.BlockSpec((T, TB, H4), lambda i: (0, i, 0)),    # gi_rz tile
            pl.BlockSpec((T, TB, H2), lambda i: (0, i, 0)),    # gi_n tile
            pl.BlockSpec((H2, H4), lambda i: (0, 0)),          # w_rz (resident)
            pl.BlockSpec((H2, H2), lambda i: (0, 0)),          # w_n  (resident)
            pl.BlockSpec((1, H2), lambda i: (0, 0)),           # bhh_n (resident)
        ],
        out_specs=pl.BlockSpec((TB, H2), lambda i: (i, 0)),
        compiler_params=pltpu.CompilerParams(
            dimension_semantics=("parallel",),
            vmem_limit_bytes=vmem_limit),
    )(lengths2d, gi_rz, gi_n, w_rz, w_n, bhh_n)
    return out[:B]


# ----------------------------------------------------------------------------
# Pure-JAX f32 reference (naive per-step form) for correctness check.
# ----------------------------------------------------------------------------
def _reference(tokens, seq_lengths, params):
    emb = jnp.take(params["embedding"], tokens, axis=0).astype(jnp.float32)
    B, T, _ = emb.shape
    H = params["whh_f"].shape[0]

    def cell(x_t, h, wih, whh, bih, bhh):
        gi = x_t @ wih + bih
        gh = h @ whh + bhh
        r = jax.nn.sigmoid(gi[:, :H] + gh[:, :H])
        z = jax.nn.sigmoid(gi[:, H:2 * H] + gh[:, H:2 * H])
        n = jnp.tanh(gi[:, 2 * H:] + r * gh[:, 2 * H:])
        return (1.0 - z) * n + z * h

    h = jnp.zeros((B, H), jnp.float32)
    for t in range(T):
        hn = cell(emb[:, t], h, params["wih_f"], params["whh_f"],
                  params["bih_f"], params["bhh_f"])
        h = jnp.where((seq_lengths > t)[:, None], hn, h)
    h_fwd = h

    h = jnp.zeros((B, H), jnp.float32)
    for t in range(T - 1, -1, -1):
        hn = cell(emb[:, t], h, params["wih_b"], params["whh_b"],
                  params["bih_b"], params["bhh_b"])
        h = jnp.where((seq_lengths > t)[:, None], hn, h)
    h_bwd = h

    return jnp.concatenate([h_fwd, h_bwd], axis=-1)


# ----------------------------------------------------------------------------
# Deterministic parameter init (mirrors the module's __init__ shapes).
# ----------------------------------------------------------------------------
def init_params(key, alphabet_size, embedding_dim, hidden_dim):
    H = hidden_dim // 2  # bidirect_flag=True
    keys = jax.random.split(key, 9)

    emb_scale = jnp.sqrt(3.0 / embedding_dim)             # random_embedding()
    embedding = jax.random.uniform(
        keys[0], (alphabet_size, embedding_dim), jnp.float32,
        minval=-emb_scale, maxval=emb_scale)

    k = 1.0 / jnp.sqrt(H)                                 # PyTorch GRU init

    def u(key, shape):
        return jax.random.uniform(key, shape, jnp.float32, minval=-k, maxval=k)

    return dict(
        embedding=embedding,
        # stored transposed for the kernel: (E, 3H), (H, 3H), biases (1, 3H),
        # gate order [r, z, n]
        wih_f=u(keys[1], (embedding_dim, 3 * H)),
        whh_f=u(keys[2], (H, 3 * H)),
        bih_f=u(keys[3], (1, 3 * H)),
        bhh_f=u(keys[4], (1, 3 * H)),
        wih_b=u(keys[5], (embedding_dim, 3 * H)),
        whh_b=u(keys[6], (H, 3 * H)),
        bih_b=u(keys[7], (1, 3 * H)),
        bhh_b=u(keys[8], (1, 3 * H)),
    )


if __name__ == "__main__":
    key = jax.random.PRNGKey(0)
    k_param, k_tok, k_tok2 = jax.random.split(key, 3)

    alphabet_size = 50
    embedding_dim = 32
    hidden_dim = 32        # bidirectional -> per-direction H = 16
    params = init_params(k_param, alphabet_size, embedding_dim, hidden_dim)

    # bf16 gi / recurrent weights (f32 accumulation) -> looser tolerance vs
    # the f32 reference.
    atol = rtol = 3e-2

    # ---- Test 1: single batch tile (B == 8). --------------------------------
    batch, word_length = 8, 8
    tokens = jax.random.randint(
        k_tok, (batch, word_length), 0, alphabet_size, dtype=jnp.int32)
    seq_lengths = jnp.array([8, 7, 6, 5, 4, 3, 2, 1], dtype=jnp.int32)

    out = jax.block_until_ready(char_bigru_forward(tokens, seq_lengths, params))
    ref = jax.block_until_ready(_reference(tokens, seq_lengths, params))
    assert out.shape == (batch, hidden_dim), out.shape
    assert jnp.allclose(out, ref, atol=atol, rtol=rtol), (
        float(jnp.max(jnp.abs(out - ref))))

    # ---- Test 2: multi-tile grid with batch padding (B = 20, T = 6). --------
    batch2, word_length2 = 20, 6
    tokens2 = jax.random.randint(
        k_tok2, (batch2, word_length2), 0, alphabet_size, dtype=jnp.int32)
    seq_lengths2 = jnp.maximum(
        word_length2 - jnp.arange(batch2, dtype=jnp.int32) // 4, 1)  # descending

    out2 = jax.block_until_ready(
        char_bigru_forward(tokens2, seq_lengths2, params))
    ref2 = jax.block_until_ready(_reference(tokens2, seq_lengths2, params))
    assert out2.shape == (batch2, hidden_dim), out2.shape
    assert jnp.allclose(out2, ref2, atol=atol, rtol=rtol), (
        float(jnp.max(jnp.abs(out2 - ref2))))

    print("KERNEL_OK")
</pallas_src>

<mosaic_0001>
module attributes {stable_mosaic.version = 11 : i64} {
  func.func @_bigru_recurrence_kernel(%arg0: i32, %arg1: memref<8x1xi32, #tpu.memory_space<vmem>>, %arg2: memref<8x8x64xbf16, #tpu.memory_space<vmem>>, %arg3: memref<8x8x32xbf16, #tpu.memory_space<vmem>>, %arg4: memref<32x64xbf16, #tpu.memory_space<vmem>>, %arg5: memref<32x32xbf16, #tpu.memory_space<vmem>>, %arg6: memref<1x32xf32, #tpu.memory_space<vmem>>, %arg7: memref<8x32xf32, #tpu.memory_space<vmem>>) attributes {dimension_semantics = [#tpu.dimension_semantics<parallel>], iteration_bounds = array<i64: 1>, scalar_prefetch = 0 : i64, scratch_operands = 0 : i64, tpu.core_type = #tpu.core_type<tc>, window_params = [{transform_indices = @transform_0, window_bounds = array<i64: 8, 1>}, {transform_indices = @transform_1, window_bounds = array<i64: 8, 8, 64>}, {transform_indices = @transform_2, window_bounds = array<i64: 8, 8, 32>}, {pipeline_mode = #tpu.pipeline_mode<synchronous>, transform_indices = @transform_3, window_bounds = array<i64: 32, 64>}, {pipeline_mode = #tpu.pipeline_mode<synchronous>, transform_indices = @transform_4, window_bounds = array<i64: 32, 32>}, {pipeline_mode = #tpu.pipeline_mode<synchronous>, transform_indices = @transform_5, window_bounds = array<i64: 1, 32>}, {transform_indices = @transform_6, window_bounds = array<i64: 8, 32>}]} {
    %c0 = arith.constant 0 : index
    %c0_0 = arith.constant 0 : index
    %0 = vector.load %arg4[%c0, %c0_0] : memref<32x64xbf16, #tpu.memory_space<vmem>>, vector<32x64xbf16>
    %c0_1 = arith.constant 0 : index
    %c0_2 = arith.constant 0 : index
    %1 = vector.load %arg5[%c0_1, %c0_2] : memref<32x32xbf16, #tpu.memory_space<vmem>>, vector<32x32xbf16>
    %c0_3 = arith.constant 0 : index
    %c0_4 = arith.constant 0 : index
    %2 = vector.load %arg6[%c0_3, %c0_4] : memref<1x32xf32, #tpu.memory_space<vmem>>, vector<1x32xf32>
    %3 = vector.shape_cast %2 : vector<1x32xf32> to vector<1x32xf32>
    %4 = vector.broadcast %3 : vector<1x32xf32> to vector<8x32xf32>
    %c0_5 = arith.constant 0 : index
    %c0_6 = arith.constant 0 : index
    %5 = vector.load %arg1[%c0_5, %c0_6] : memref<8x1xi32, #tpu.memory_space<vmem>>, vector<8x1xi32>
    %6 = vector.shape_cast %5 : vector<8x1xi32> to vector<8x1xi32>
    %7 = vector.broadcast %6 : vector<8x1xi32> to vector<8x32xi32>
    %8 = tpu.iota {dimensions = array<i32: 1>} : vector<8x32xi32>
    %c16_i32 = arith.constant 16 : i32
    %9 = vector.broadcast %c16_i32 : i32 to vector<8x32xi32>
    %10 = arith.cmpi slt, %8, %9 : vector<8x32xi32>
    %11 = arith.extui %10 : vector<8x32xi1> to vector<8x32xi32>
    %c1_i32 = arith.constant 1 : i32
    %12 = vector.broadcast %c1_i32 : i32 to vector<8x32xi32>
    %13 = arith.subi %12, %11 : vector<8x32xi32>
    %c7_i32 = arith.constant 7 : i32
    %14 = vector.broadcast %c7_i32 : i32 to vector<8x32xi32>
    %15 = arith.muli %13, %14 : vector<8x32xi32>
    %c2_i32 = arith.constant 2 : i32
    %16 = vector.broadcast %c2_i32 : i32 to vector<8x32xi32>
    %17 = arith.muli %16, %11 : vector<8x32xi32>
    %c1_i32_7 = arith.constant 1 : i32
    %18 = vector.broadcast %c1_i32_7 : i32 to vector<8x32xi32>
    %19 = arith.subi %17, %18 : vector<8x32xi32>
    %cst = arith.constant 0.000000e+00 : f32
    %20 = vector.broadcast %cst : f32 to vector<8x32xf32>
    %c0_i32 = arith.constant 0 : i32
    %21 = arith.index_cast %c0_i32 : i32 to index
    %c0_8 = arith.constant 0 : index
    %c0_9 = arith.constant 0 : index
    %22 = vector.load %arg2[%21, %c0_8, %c0_9] : memref<8x8x64xbf16, #tpu.memory_space<vmem>>, vector<1x8x64xbf16>
    %23 = vector.shape_cast %22 : vector<1x8x64xbf16> to vector<8x64xbf16>
    %24 = arith.index_cast %c0_i32 : i32 to index
    %c0_10 = arith.constant 0 : index
    %c0_11 = arith.constant 0 : index
    %25 = vector.load %arg3[%24, %c0_10, %c0_11] : memref<8x8x32xbf16, #tpu.memory_space<vmem>>, vector<1x8x32xbf16>
    %26 = vector.shape_cast %25 : vector<1x8x32xbf16> to vector<8x32xbf16>
    %27 = arith.truncf %20 : vector<8x32xf32> to vector<8x32xbf16>
    %cst_12 = arith.constant dense<0.000000e+00> : vector<8x64xf32>
    %28 = tpu.matmul %27, %0, %cst_12 {dimension_numbers = #tpu.dot_dimension_numbers<[1], [0], [0], [1], [0, 0, 1, 1], [], []>} : vector<8x32xbf16>, vector<32x64xbf16>, vector<8x64xf32> -> vector<8x64xf32>
    %cst_13 = arith.constant dense<0.000000e+00> : vector<8x32xf32>
    %29 = tpu.matmul %27, %1, %cst_13 {dimension_numbers = #tpu.dot_dimension_numbers<[1], [0], [0], [1], [0, 0, 1, 1], [], []>} : vector<8x32xbf16>, vector<32x32xbf16>, vector<8x32xf32> -> vector<8x32xf32>
    %30 = arith.extf %23 : vector<8x64xbf16> to vector<8x64xf32>
    %31 = arith.addf %30, %28 : vector<8x64xf32>
    %32 = arith.negf %31 : vector<8x64xf32>
    %33 = math.exp %32 : vector<8x64xf32>
    %cst_14 = arith.constant 1.000000e+00 : f32
    %34 = vector.broadcast %cst_14 : f32 to vector<8x64xf32>
    %35 = arith.addf %34, %33 : vector<8x64xf32>
    %36 = arith.divf %34, %35 : vector<8x64xf32>
    %37 = vector.extract_strided_slice %36 {offsets = [0, 0], sizes = [8, 32], strides = [1, 1]} : vector<8x64xf32> to vector<8x32xf32>
    %38 = vector.extract_strided_slice %36 {offsets = [0, 32], sizes = [8, 32], strides = [1, 1]} : vector<8x64xf32> to vector<8x32xf32>
    %39 = arith.extf %26 : vector<8x32xbf16> to vector<8x32xf32>
    %40 = arith.addf %29, %4 : vector<8x32xf32>
    %41 = arith.mulf %37, %40 : vector<8x32xf32>
    %42 = arith.addf %39, %41 : vector<8x32xf32>
    %43 = math.tanh %42 : vector<8x32xf32>
    %cst_15 = arith.constant 1.000000e+00 : f32
    %44 = vector.broadcast %cst_15 : f32 to vector<8x32xf32>
    %45 = arith.subf %44, %38 : vector<8x32xf32>
    %46 = arith.mulf %45, %43 : vector<8x32xf32>
    %47 = arith.mulf %38, %20 : vector<8x32xf32>
    %48 = arith.addf %46, %47 : vector<8x32xf32>
    %49 = vector.broadcast %c0_i32 : i32 to vector<8x32xi32>
    %50 = arith.muli %19, %49 : vector<8x32xi32>
    %51 = arith.addi %15, %50 : vector<8x32xi32>
    %52 = arith.cmpi slt, %51, %7 : vector<8x32xi32>
    %53 = arith.select %52, %48, %20 : vector<8x32xi1>, vector<8x32xf32>
    %c1_i32_16 = arith.constant 1 : i32
    %54 = arith.index_cast %c1_i32_16 : i32 to index
    %c0_17 = arith.constant 0 : index
    %c0_18 = arith.constant 0 : index
    %55 = vector.load %arg2[%54, %c0_17, %c0_18] : memref<8x8x64xbf16, #tpu.memory_space<vmem>>, vector<1x8x64xbf16>
    %56 = vector.shape_cast %55 : vector<1x8x64xbf16> to vector<8x64xbf16>
    %57 = arith.index_cast %c1_i32_16 : i32 to index
    %c0_19 = arith.constant 0 : index
    %c0_20 = arith.constant 0 : index
    %58 = vector.load %arg3[%57, %c0_19, %c0_20] : memref<8x8x32xbf16, #tpu.memory_space<vmem>>, vector<1x8x32xbf16>
    %59 = vector.shape_cast %58 : vector<1x8x32xbf16> to vector<8x32xbf16>
    %60 = arith.truncf %53 : vector<8x32xf32> to vector<8x32xbf16>
    %cst_21 = arith.constant dense<0.000000e+00> : vector<8x64xf32>
    %61 = tpu.matmul %60, %0, %cst_21 {dimension_numbers = #tpu.dot_dimension_numbers<[1], [0], [0], [1], [0, 0, 1, 1], [], []>} : vector<8x32xbf16>, vector<32x64xbf16>, vector<8x64xf32> -> vector<8x64xf32>
    %cst_22 = arith.constant dense<0.000000e+00> : vector<8x32xf32>
    %62 = tpu.matmul %60, %1, %cst_22 {dimension_numbers = #tpu.dot_dimension_numbers<[1], [0], [0], [1], [0, 0, 1, 1], [], []>} : vector<8x32xbf16>, vector<32x32xbf16>, vector<8x32xf32> -> vector<8x32xf32>
    %63 = arith.extf %56 : vector<8x64xbf16> to vector<8x64xf32>
    %64 = arith.addf %63, %61 : vector<8x64xf32>
    %65 = arith.negf %64 : vector<8x64xf32>
    %66 = math.exp %65 : vector<8x64xf32>
    %cst_23 = arith.constant 1.000000e+00 : f32
    %67 = vector.broadcast %cst_23 : f32 to vector<8x64xf32>
    %68 = arith.addf %67, %66 : vector<8x64xf32>
    %69 = arith.divf %67, %68 : vector<8x64xf32>
    %70 = vector.extract_strided_slice %69 {offsets = [0, 0], sizes = [8, 32], strides = [1, 1]} : vector<8x64xf32> to vector<8x32xf32>
    %71 = vector.extract_strided_slice %69 {offsets = [0, 32], sizes = [8, 32], strides = [1, 1]} : vector<8x64xf32> to vector<8x32xf32>
    %72 = arith.extf %59 : vector<8x32xbf16> to vector<8x32xf32>
    %73 = arith.addf %62, %4 : vector<8x32xf32>
    %74 = arith.mulf %70, %73 : vector<8x32xf32>
    %75 = arith.addf %72, %74 : vector<8x32xf32>
    %76 = math.tanh %75 : vector<8x32xf32>
    %cst_24 = arith.constant 1.000000e+00 : f32
    %77 = vector.broadcast %cst_24 : f32 to vector<8x32xf32>
    %78 = arith.subf %77, %71 : vector<8x32xf32>
    %79 = arith.mulf %78, %76 : vector<8x32xf32>
    %80 = arith.mulf %71, %53 : vector<8x32xf32>
    %81 = arith.addf %79, %80 : vector<8x32xf32>
    %82 = vector.broadcast %c1_i32_16 : i32 to vector<8x32xi32>
    %83 = arith.muli %19, %82 : vector<8x32xi32>
    %84 = arith.addi %15, %83 : vector<8x32xi32>
    %85 = arith.cmpi slt, %84, %7 : vector<8x32xi32>
    %86 = arith.select %85, %81, %53 : vector<8x32xi1>, vector<8x32xf32>
    %c2_i32_25 = arith.constant 2 : i32
    %87 = arith.index_cast %c2_i32_25 : i32 to index
    %c0_26 = arith.constant 0 : index
    %c0_27 = arith.constant 0 : index
    %88 = vector.load %arg2[%87, %c0_26, %c0_27] : memref<8x8x64xbf16, #tpu.memory_space<vmem>>, vector<1x8x64xbf16>
    %89 = vector.shape_cast %88 : vector<1x8x64xbf16> to vector<8x64xbf16>
    %90 = arith.index_cast %c2_i32_25 : i32 to index
    %c0_28 = arith.constant 0 : index
    %c0_29 = arith.constant 0 : index
    %91 = vector.load %arg3[%90, %c0_28, %c0_29] : memref<8x8x32xbf16, #tpu.memory_space<vmem>>, vector<1x8x32xbf16>
    %92 = vector.shape_cast %91 : vector<1x8x32xbf16> to vector<8x32xbf16>
    %93 = arith.truncf %86 : vector<8x32xf32> to vector<8x32xbf16>
    %cst_30 = arith.constant dense<0.000000e+00> : vector<8x64xf32>
    %94 = tpu.matmul %93, %0, %cst_30 {dimension_numbers = #tpu.dot_dimension_numbers<[1], [0], [0], [1], [0, 0, 1, 1], [], []>} : vector<8x32xbf16>, vector<32x64xbf16>, vector<8x64xf32> -> vector<8x64xf32>
    %cst_31 = arith.constant dense<0.000000e+00> : vector<8x32xf32>
    %95 = tpu.matmul %93, %1, %cst_31 {dimension_numbers = #tpu.dot_dimension_numbers<[1], [0], [0], [1], [0, 0, 1, 1], [], []>} : vector<8x32xbf16>, vector<32x32xbf16>, vector<8x32xf32> -> vector<8x32xf32>
    %96 = arith.extf %89 : vector<8x64xbf16> to vector<8x64xf32>
    %97 = arith.addf %96, %94 : vector<8x64xf32>
    %98 = arith.negf %97 : vector<8x64xf32>
    %99 = math.exp %98 : vector<8x64xf32>
    %cst_32 = arith.constant 1.000000e+00 : f32
    %100 = vector.broadcast %cst_32 : f32 to vector<8x64xf32>
    %101 = arith.addf %100, %99 : vector<8x64xf32>
    %102 = arith.divf %100, %101 : vector<8x64xf32>
    %103 = vector.extract_strided_slice %102 {offsets = [0, 0], sizes = [8, 32], strides = [1, 1]} : vector<8x64xf32> to vector<8x32xf32>
    %104 = vector.extract_strided_slice %102 {offsets = [0, 32], sizes = [8, 32], strides = [1, 1]} : vector<8x64xf32> to vector<8x32xf32>
    %105 = arith.extf %92 : vector<8x32xbf16> to vector<8x32xf32>
    %106 = arith.addf %95, %4 : vector<8x32xf32>
    %107 = arith.mulf %103, %106 : vector<8x32xf32>
    %108 = arith.addf %105, %107 : vector<8x32xf32>
    %109 = math.tanh %108 : vector<8x32xf32>
    %cst_33 = arith.constant 1.000000e+00 : f32
    %110 = vector.broadcast %cst_33 : f32 to vector<8x32xf32>
    %111 = arith.subf %110, %104 : vector<8x32xf32>
    %112 = arith.mulf %111, %109 : vector<8x32xf32>
    %113 = arith.mulf %104, %86 : vector<8x32xf32>
    %114 = arith.addf %112, %113 : vector<8x32xf32>
    %115 = vector.broadcast %c2_i32_25 : i32 to vector<8x32xi32>
    %116 = arith.muli %19, %115 : vector<8x32xi32>
    %117 = arith.addi %15, %116 : vector<8x32xi32>
    %118 = arith.cmpi slt, %117, %7 : vector<8x32xi32>
    %119 = arith.select %118, %114, %86 : vector<8x32xi1>, vector<8x32xf32>
    %c3_i32 = arith.constant 3 : i32
    %120 = arith.index_cast %c3_i32 : i32 to index
    %c0_34 = arith.constant 0 : index
    %c0_35 = arith.constant 0 : index
    %121 = vector.load %arg2[%120, %c0_34, %c0_35] : memref<8x8x64xbf16, #tpu.memory_space<vmem>>, vector<1x8x64xbf16>
    %122 = vector.shape_cast %121 : vector<1x8x64xbf16> to vector<8x64xbf16>
    %123 = arith.index_cast %c3_i32 : i32 to index
    %c0_36 = arith.constant 0 : index
    %c0_37 = arith.constant 0 : index
    %124 = vector.load %arg3[%123, %c0_36, %c0_37] : memref<8x8x32xbf16, #tpu.memory_space<vmem>>, vector<1x8x32xbf16>
    %125 = vector.shape_cast %124 : vector<1x8x32xbf16> to vector<8x32xbf16>
    %126 = arith.truncf %119 : vector<8x32xf32> to vector<8x32xbf16>
    %cst_38 = arith.constant dense<0.000000e+00> : vector<8x64xf32>
    %127 = tpu.matmul %126, %0, %cst_38 {dimension_numbers = #tpu.dot_dimension_numbers<[1], [0], [0], [1], [0, 0, 1, 1], [], []>} : vector<8x32xbf16>, vector<32x64xbf16>, vector<8x64xf32> -> vector<8x64xf32>
    %cst_39 = arith.constant dense<0.000000e+00> : vector<8x32xf32>
    %128 = tpu.matmul %126, %1, %cst_39 {dimension_numbers = #tpu.dot_dimension_numbers<[1], [0], [0], [1], [0, 0, 1, 1], [], []>} : vector<8x32xbf16>, vector<32x32xbf16>, vector<8x32xf32> -> vector<8x32xf32>
    %129 = arith.extf %122 : vector<8x64xbf16> to vector<8x64xf32>
    %130 = arith.addf %129, %127 : vector<8x64xf32>
    %131 = arith.negf %130 : vector<8x64xf32>
    %132 = math.exp %131 : vector<8x64xf32>
    %cst_40 = arith.constant 1.000000e+00 : f32
    %133 = vector.broadcast %cst_40 : f32 to vector<8x64xf32>
    %134 = arith.addf %133, %132 : vector<8x64xf32>
    %135 = arith.divf %133, %134 : vector<8x64xf32>
    %136 = vector.extract_strided_slice %135 {offsets = [0, 0], sizes = [8, 32], strides = [1, 1]} : vector<8x64xf32> to vector<8x32xf32>
    %137 = vector.extract_strided_slice %135 {offsets = [0, 32], sizes = [8, 32], strides = [1, 1]} : vector<8x64xf32> to vector<8x32xf32>
    %138 = arith.extf %125 : vector<8x32xbf16> to vector<8x32xf32>
    %139 = arith.addf %128, %4 : vector<8x32xf32>
    %140 = arith.mulf %136, %139 : vector<8x32xf32>
    %141 = arith.addf %138, %140 : vector<8x32xf32>
    %142 = math.tanh %141 : vector<8x32xf32>
    %cst_41 = arith.constant 1.000000e+00 : f32
    %143 = vector.broadcast %cst_41 : f32 to vector<8x32xf32>
    %144 = arith.subf %143, %137 : vector<8x32xf32>
    %145 = arith.mulf %144, %142 : vector<8x32xf32>
    %146 = arith.mulf %137, %119 : vector<8x32xf32>
    %147 = arith.addf %145, %146 : vector<8x32xf32>
    %148 = vector.broadcast %c3_i32 : i32 to vector<8x32xi32>
    %149 = arith.muli %19, %148 : vector<8x32xi32>
    %150 = arith.addi %15, %149 : vector<8x32xi32>
    %151 = arith.cmpi slt, %150, %7 : vector<8x32xi32>
    %152 = arith.select %151, %147, %119 : vector<8x32xi1>, vector<8x32xf32>
    %c4_i32 = arith.constant 4 : i32
    %153 = arith.index_cast %c4_i32 : i32 to index
    %c0_42 = arith.constant 0 : index
    %c0_43 = arith.constant 0 : index
    %154 = vector.load %arg2[%153, %c0_42, %c0_43] : memref<8x8x64xbf16, #tpu.memory_space<vmem>>, vector<1x8x64xbf16>
    %155 = vector.shape_cast %154 : vector<1x8x64xbf16> to vector<8x64xbf16>
    %156 = arith.index_cast %c4_i32 : i32 to index
    %c0_44 = arith.constant 0 : index
    %c0_45 = arith.constant 0 : index
    %157 = vector.load %arg3[%156, %c0_44, %c0_45] : memref<8x8x32xbf16, #tpu.memory_space<vmem>>, vector<1x8x32xbf16>
    %158 = vector.shape_cast %157 : vector<1x8x32xbf16> to vector<8x32xbf16>
    %159 = arith.truncf %152 : vector<8x32xf32> to vector<8x32xbf16>
    %cst_46 = arith.constant dense<0.000000e+00> : vector<8x64xf32>
    %160 = tpu.matmul %159, %0, %cst_46 {dimension_numbers = #tpu.dot_dimension_numbers<[1], [0], [0], [1], [0, 0, 1, 1], [], []>} : vector<8x32xbf16>, vector<32x64xbf16>, vector<8x64xf32> -> vector<8x64xf32>
    %cst_47 = arith.constant dense<0.000000e+00> : vector<8x32xf32>
    %161 = tpu.matmul %159, %1, %cst_47 {dimension_numbers = #tpu.dot_dimension_numbers<[1], [0], [0], [1], [0, 0, 1, 1], [], []>} : vector<8x32xbf16>, vector<32x32xbf16>, vector<8x32xf32> -> vector<8x32xf32>
    %162 = arith.extf %155 : vector<8x64xbf16> to vector<8x64xf32>
    %163 = arith.addf %162, %160 : vector<8x64xf32>
    %164 = arith.negf %163 : vector<8x64xf32>
    %165 = math.exp %164 : vector<8x64xf32>
    %cst_48 = arith.constant 1.000000e+00 : f32
    %166 = vector.broadcast %cst_48 : f32 to vector<8x64xf32>
    %167 = arith.addf %166, %165 : vector<8x64xf32>
    %168 = arith.divf %166, %167 : vector<8x64xf32>
    %169 = vector.extract_strided_slice %168 {offsets = [0, 0], sizes = [8, 32], strides = [1, 1]} : vector<8x64xf32> to vector<8x32xf32>
    %170 = vector.extract_strided_slice %168 {offsets = [0, 32], sizes = [8, 32], strides = [1, 1]} : vector<8x64xf32> to vector<8x32xf32>
    %171 = arith.extf %158 : vector<8x32xbf16> to vector<8x32xf32>
    %172 = arith.addf %161, %4 : vector<8x32xf32>
    %173 = arith.mulf %169, %172 : vector<8x32xf32>
    %174 = arith.addf %171, %173 : vector<8x32xf32>
    %175 = math.tanh %174 : vector<8x32xf32>
    %cst_49 = arith.constant 1.000000e+00 : f32
    %176 = vector.broadcast %cst_49 : f32 to vector<8x32xf32>
    %177 = arith.subf %176, %170 : vector<8x32xf32>
    %178 = arith.mulf %177, %175 : vector<8x32xf32>
    %179 = arith.mulf %170, %152 : vector<8x32xf32>
    %180 = arith.addf %178, %179 : vector<8x32xf32>
    %181 = vector.broadcast %c4_i32 : i32 to vector<8x32xi32>
    %182 = arith.muli %19, %181 : vector<8x32xi32>
    %183 = arith.addi %15, %182 : vector<8x32xi32>
    %184 = arith.cmpi slt, %183, %7 : vector<8x32xi32>
    %185 = arith.select %184, %180, %152 : vector<8x32xi1>, vector<8x32xf32>
    %c5_i32 = arith.constant 5 : i32
    %186 = arith.index_cast %c5_i32 : i32 to index
    %c0_50 = arith.constant 0 : index
    %c0_51 = arith.constant 0 : index
    %187 = vector.load %arg2[%186, %c0_50, %c0_51] : memref<8x8x64xbf16, #tpu.memory_space<vmem>>, vector<1x8x64xbf16>
    %188 = vector.shape_cast %187 : vector<1x8x64xbf16> to vector<8x64xbf16>
    %189 = arith.index_cast %c5_i32 : i32 to index
    %c0_52 = arith.constant 0 : index
    %c0_53 = arith.constant 0 : index
    %190 = vector.load %arg3[%189, %c0_52, %c0_53] : memref<8x8x32xbf16, #tpu.memory_space<vmem>>, vector<1x8x32xbf16>
    %191 = vector.shape_cast %190 : vector<1x8x32xbf16> to vector<8x32xbf16>
    %192 = arith.truncf %185 : vector<8x32xf32> to vector<8x32xbf16>
    %cst_54 = arith.constant dense<0.000000e+00> : vector<8x64xf32>
    %193 = tpu.matmul %192, %0, %cst_54 {dimension_numbers = #tpu.dot_dimension_numbers<[1], [0], [0], [1], [0, 0, 1, 1], [], []>} : vector<8x32xbf16>, vector<32x64xbf16>, vector<8x64xf32> -> vector<8x64xf32>
    %cst_55 = arith.constant dense<0.000000e+00> : vector<8x32xf32>
    %194 = tpu.matmul %192, %1, %cst_55 {dimension_numbers = #tpu.dot_dimension_numbers<[1], [0], [0], [1], [0, 0, 1, 1], [], []>} : vector<8x32xbf16>, vector<32x32xbf16>, vector<8x32xf32> -> vector<8x32xf32>
    %195 = arith.extf %188 : vector<8x64xbf16> to vector<8x64xf32>
    %196 = arith.addf %195, %193 : vector<8x64xf32>
    %197 = arith.negf %196 : vector<8x64xf32>
    %198 = math.exp %197 : vector<8x64xf32>
    %cst_56 = arith.constant 1.000000e+00 : f32
    %199 = vector.broadcast %cst_56 : f32 to vector<8x64xf32>
    %200 = arith.addf %199, %198 : vector<8x64xf32>
    %201 = arith.divf %199, %200 : vector<8x64xf32>
    %202 = vector.extract_strided_slice %201 {offsets = [0, 0], sizes = [8, 32], strides = [1, 1]} : vector<8x64xf32> to vector<8x32xf32>
    %203 = vector.extract_strided_slice %201 {offsets = [0, 32], sizes = [8, 32], strides = [1, 1]} : vector<8x64xf32> to vector<8x32xf32>
    %204 = arith.extf %191 : vector<8x32xbf16> to vector<8x32xf32>
    %205 = arith.addf %194, %4 : vector<8x32xf32>
    %206 = arith.mulf %202, %205 : vector<8x32xf32>
    %207 = arith.addf %204, %206 : vector<8x32xf32>
    %208 = math.tanh %207 : vector<8x32xf32>
    %cst_57 = arith.constant 1.000000e+00 : f32
    %209 = vector.broadcast %cst_57 : f32 to vector<8x32xf32>
    %210 = arith.subf %209, %203 : vector<8x32xf32>
    %211 = arith.mulf %210, %208 : vector<8x32xf32>
    %212 = arith.mulf %203, %185 : vector<8x32xf32>
    %213 = arith.addf %211, %212 : vector<8x32xf32>
    %214 = vector.broadcast %c5_i32 : i32 to vector<8x32xi32>
    %215 = arith.muli %19, %214 : vector<8x32xi32>
    %216 = arith.addi %15, %215 : vector<8x32xi32>
    %217 = arith.cmpi slt, %216, %7 : vector<8x32xi32>
    %218 = arith.select %217, %213, %185 : vector<8x32xi1>, vector<8x32xf32>
    %c6_i32 = arith.constant 6 : i32
    %219 = arith.index_cast %c6_i32 : i32 to index
    %c0_58 = arith.constant 0 : index
    %c0_59 = arith.constant 0 : index
    %220 = vector.load %arg2[%219, %c0_58, %c0_59] : memref<8x8x64xbf16, #tpu.memory_space<vmem>>, vector<1x8x64xbf16>
    %221 = vector.shape_cast %220 : vector<1x8x64xbf16> to vector<8x64xbf16>
    %222 = arith.index_cast %c6_i32 : i32 to index
    %c0_60 = arith.constant 0 : index
    %c0_61 = arith.constant 0 : index
    %223 = vector.load %arg3[%222, %c0_60, %c0_61] : memref<8x8x32xbf16, #tpu.memory_space<vmem>>, vector<1x8x32xbf16>
    %224 = vector.shape_cast %223 : vector<1x8x32xbf16> to vector<8x32xbf16>
    %225 = arith.truncf %218 : vector<8x32xf32> to vector<8x32xbf16>
    %cst_62 = arith.constant dense<0.000000e+00> : vector<8x64xf32>
    %226 = tpu.matmul %225, %0, %cst_62 {dimension_numbers = #tpu.dot_dimension_numbers<[1], [0], [0], [1], [0, 0, 1, 1], [], []>} : vector<8x32xbf16>, vector<32x64xbf16>, vector<8x64xf32> -> vector<8x64xf32>
    %cst_63 = arith.constant dense<0.000000e+00> : vector<8x32xf32>
    %227 = tpu.matmul %225, %1, %cst_63 {dimension_numbers = #tpu.dot_dimension_numbers<[1], [0], [0], [1], [0, 0, 1, 1], [], []>} : vector<8x32xbf16>, vector<32x32xbf16>, vector<8x32xf32> -> vector<8x32xf32>
    %228 = arith.extf %221 : vector<8x64xbf16> to vector<8x64xf32>
    %229 = arith.addf %228, %226 : vector<8x64xf32>
    %230 = arith.negf %229 : vector<8x64xf32>
    %231 = math.exp %230 : vector<8x64xf32>
    %cst_64 = arith.constant 1.000000e+00 : f32
    %232 = vector.broadcast %cst_64 : f32 to vector<8x64xf32>
    %233 = arith.addf %232, %231 : vector<8x64xf32>
    %234 = arith.divf %232, %233 : vector<8x64xf32>
    %235 = vector.extract_strided_slice %234 {offsets = [0, 0], sizes = [8, 32], strides = [1, 1]} : vector<8x64xf32> to vector<8x32xf32>
    %236 = vector.extract_strided_slice %234 {offsets = [0, 32], sizes = [8, 32], strides = [1, 1]} : vector<8x64xf32> to vector<8x32xf32>
    %237 = arith.extf %224 : vector<8x32xbf16> to vector<8x32xf32>
    %238 = arith.addf %227, %4 : vector<8x32xf32>
    %239 = arith.mulf %235, %238 : vector<8x32xf32>
    %240 = arith.addf %237, %239 : vector<8x32xf32>
    %241 = math.tanh %240 : vector<8x32xf32>
    %cst_65 = arith.constant 1.000000e+00 : f32
    %242 = vector.broadcast %cst_65 : f32 to vector<8x32xf32>
    %243 = arith.subf %242, %236 : vector<8x32xf32>
    %244 = arith.mulf %243, %241 : vector<8x32xf32>
    %245 = arith.mulf %236, %218 : vector<8x32xf32>
    %246 = arith.addf %244, %245 : vector<8x32xf32>
    %247 = vector.broadcast %c6_i32 : i32 to vector<8x32xi32>
    %248 = arith.muli %19, %247 : vector<8x32xi32>
    %249 = arith.addi %15, %248 : vector<8x32xi32>
    %250 = arith.cmpi slt, %249, %7 : vector<8x32xi32>
    %251 = arith.select %250, %246, %218 : vector<8x32xi1>, vector<8x32xf32>
    %c7_i32_66 = arith.constant 7 : i32
    %252 = arith.index_cast %c7_i32_66 : i32 to index
    %c0_67 = arith.constant 0 : index
    %c0_68 = arith.constant 0 : index
    %253 = vector.load %arg2[%252, %c0_67, %c0_68] : memref<8x8x64xbf16, #tpu.memory_space<vmem>>, vector<1x8x64xbf16>
    %254 = vector.shape_cast %253 : vector<1x8x64xbf16> to vector<8x64xbf16>
    %255 = arith.index_cast %c7_i32_66 : i32 to index
    %c0_69 = arith.constant 0 : index
    %c0_70 = arith.constant 0 : index
    %256 = vector.load %arg3[%255, %c0_69, %c0_70] : memref<8x8x32xbf16, #tpu.memory_space<vmem>>, vector<1x8x32xbf16>
    %257 = vector.shape_cast %256 : vector<1x8x32xbf16> to vector<8x32xbf16>
    %258 = arith.truncf %251 : vector<8x32xf32> to vector<8x32xbf16>
    %cst_71 = arith.constant dense<0.000000e+00> : vector<8x64xf32>
    %259 = tpu.matmul %258, %0, %cst_71 {dimension_numbers = #tpu.dot_dimension_numbers<[1], [0], [0], [1], [0, 0, 1, 1], [], []>} : vector<8x32xbf16>, vector<32x64xbf16>, vector<8x64xf32> -> vector<8x64xf32>
    %cst_72 = arith.constant dense<0.000000e+00> : vector<8x32xf32>
    %260 = tpu.matmul %258, %1, %cst_72 {dimension_numbers = #tpu.dot_dimension_numbers<[1], [0], [0], [1], [0, 0, 1, 1], [], []>} : vector<8x32xbf16>, vector<32x32xbf16>, vector<8x32xf32> -> vector<8x32xf32>
    %261 = arith.extf %254 : vector<8x64xbf16> to vector<8x64xf32>
    %262 = arith.addf %261, %259 : vector<8x64xf32>
    %263 = arith.negf %262 : vector<8x64xf32>
    %264 = math.exp %263 : vector<8x64xf32>
    %cst_73 = arith.constant 1.000000e+00 : f32
    %265 = vector.broadcast %cst_73 : f32 to vector<8x64xf32>
    %266 = arith.addf %265, %264 : vector<8x64xf32>
    %267 = arith.divf %265, %266 : vector<8x64xf32>
    %268 = vector.extract_strided_slice %267 {offsets = [0, 0], sizes = [8, 32], strides = [1, 1]} : vector<8x64xf32> to vector<8x32xf32>
    %269 = vector.extract_strided_slice %267 {offsets = [0, 32], sizes = [8, 32], strides = [1, 1]} : vector<8x64xf32> to vector<8x32xf32>
    %270 = arith.extf %257 : vector<8x32xbf16> to vector<8x32xf32>
    %271 = arith.addf %260, %4 : vector<8x32xf32>
    %272 = arith.mulf %268, %271 : vector<8x32xf32>
    %273 = arith.addf %270, %272 : vector<8x32xf32>
    %274 = math.tanh %273 : vector<8x32xf32>
    %cst_74 = arith.constant 1.000000e+00 : f32
    %275 = vector.broadcast %cst_74 : f32 to vector<8x32xf32>
    %276 = arith.subf %275, %269 : vector<8x32xf32>
    %277 = arith.mulf %276, %274 : vector<8x32xf32>
    %278 = arith.mulf %269, %251 : vector<8x32xf32>
    %279 = arith.addf %277, %278 : vector<8x32xf32>
    %280 = vector.broadcast %c7_i32_66 : i32 to vector<8x32xi32>
    %281 = arith.muli %19, %280 : vector<8x32xi32>
    %282 = arith.addi %15, %281 : vector<8x32xi32>
    %283 = arith.cmpi slt, %282, %7 : vector<8x32xi32>
    %284 = arith.select %283, %279, %251 : vector<8x32xi1>, vector<8x32xf32>
    %c8_i32 = arith.constant 8 : i32
    %c0_75 = arith.constant 0 : index
    %c0_76 = arith.constant 0 : index
    %285 = vector.load %arg7[%c0_75, %c0_76] : memref<8x32xf32, #tpu.memory_space<vmem>>, vector<8x32xf32>
    tpu.vector_store %arg7[%c0_75, %c0_76], %284 {strides = array<i32>} : memref<8x32xf32, #tpu.memory_space<vmem>>, vector<8x32xf32>,
    return
  }
  func.func @transform_0(%arg0: i32) -> (i32, i32) {
    %c0_i32 = arith.constant 0 : i32
    %c0_i32_0 = arith.constant 0 : i32
    return %arg0, %c0_i32 : i32, i32
  }
  func.func @transform_1(%arg0: i32) -> (i32, i32, i32) {
    %c0_i32 = arith.constant 0 : i32
    %c0_i32_0 = arith.constant 0 : i32
    %c0_i32_1 = arith.constant 0 : i32
    return %c0_i32, %arg0, %c0_i32_0 : i32, i32, i32
  }
  func.func @transform_2(%arg0: i32) -> (i32, i32, i32) {
    %c0_i32 = arith.constant 0 : i32
    %c0_i32_0 = arith.constant 0 : i32
    %c0_i32_1 = arith.constant 0 : i32
    return %c0_i32, %arg0, %c0_i32_0 : i32, i32, i32
  }
  func.func @transform_3(%arg0: i32) -> (i32, i32) {
    %c0_i32 = arith.constant 0 : i32
    %c0_i32_0 = arith.constant 0 : i32
    %c0_i32_1 = arith.constant 0 : i32
    return %c0_i32, %c0_i32_0 : i32, i32
  }
  func.func @transform_4(%arg0: i32) -> (i32, i32) {
    %c0_i32 = arith.constant 0 : i32
    %c0_i32_0 = arith.constant 0 : i32
    %c0_i32_1 = arith.constant 0 : i32
    return %c0_i32, %c0_i32_0 : i32, i32
  }
  func.func @transform_5(%arg0: i32) -> (i32, i32) {
    %c0_i32 = arith.constant 0 : i32
    %c0_i32_0 = arith.constant 0 : i32
    %c0_i32_1 = arith.constant 0 : i32
    return %c0_i32, %c0_i32_0 : i32, i32
  }
  func.func @transform_6(%arg0: i32) -> (i32, i32) {
    %c0_i32 = arith.constant 0 : i32
    %c0_i32_0 = arith.constant 0 : i32
    return %arg0, %c0_i32 : i32, i32
  }
}

</mosaic_0001>

<bundles_post_ra>
// kernel: tpu_custom_call.1
= control target key start
LH: loop header
LB: loop body
LE: loop exit
PB: predicated region body
PF: predicated region fallthrough
CT: control target
= control target key end

     0   :  { %11 = vsyncpa [#allocation3], 0  ;;  %s1760_s0 = inlined_call_operand.vmem [shape: s32[8,1], index: 0, kind: input, shape index: {}]   ;;  %s1761_s1 = inlined_call_operand.hbm [shape: bf16[8,8,64], index: 1, kind: input, shape index: {}]   ;;  %s1762_s2 = inlined_call_operand.hbm [shape: bf16[8,8,32], index: 2, kind: input, shape index: {}]   ;;  %s1763_s3 = inlined_call_operand.vmem [shape: bf16[32,64], index: 3, kind: input, shape index: {}]   ;;  %s1764_s4 = inlined_call_operand.hbm [shape: bf16[32,32], index: 4, kind: input, shape index: {}]   ;;  %s1765_s5 = inlined_call_operand.vmem [shape: f32[1,32], index: 5, kind: input, shape index: {}]   ;;  %s1766_s6 = inlined_call_operand.hbm [shape: f32[8,32], index: 6, kind: output, shape index: {}]  }
   0x1   :  { %12 = vsyncpa [#allocation6], 0 }
   0x2   :  { %13 = vsyncpa [#allocation4], 0  ;;  %s1447_s21 = smov [#allocation5]   ;;  %s1448_s23 = smov [#allocation2]  }
   0x3   :  { %s33_s22 = sshll.u32 %s1447_s21, 4  ;;  %s21_s24 = sshll.u32 %s1448_s23, 4  ;;  %s34_s22 = int_to_ptr.vmem [resolvable:$true] %s33_s22  ;;  %s1493_s24 = int_to_ptr.vmem [resolvable:$true] %s21_s24 }
   0x4   :  { %s1353_s27 = scalar_lea.hbm %s1762_s2, 512 }
   0x5   :  { %p1354_p0 = scmp.ne.s32.totalorder %s1762_s2, %s1353_s27  ;;  %p1357_p1 = scmp.lt.u32.totalorder %s1353_s27, %s1762_s2 }
   0x7   :  { %p1359_p2 = pnand %p1357_p1, %p1354_p0 }
   0x9   :  { %1362 = shalt.err (!%p1359_p2)
}
   0xa   :  { %s1363_s8 = scalar_lea.vmem %s34_s22, 512  ;;  %p1368_p4 = scmp.lt.s32.totalorder %s34_s22, %s34_s22 }
   0xb   :  { %p1364_p3 = scmp.ne.s32.totalorder %s34_s22, %s1363_s8  ;;  %p1369_p5 = scmp.lt.s32.totalorder %s1363_s8, %s1363_s8 }
   0xd   :  { %p1370_p6 = por %p1369_p5, %p1368_p4 }
   0xf   :  { %p1371_p7 = pnand %p1370_p6, %p1364_p3 }
  0x11   :  { %1374 = shalt.err (!%p1371_p7)
}
  0x12   :  { %s1449_s9 = smov 64   ;;  %s1450_s10 = smov 4  }
  0x13   :  { %39 = dma.hbm_to_vmem [thread:$0]  %s1762_s2, 512, %s34_s22, [#allocation6], %s1449_s9, %s1449_s9, %s1450_s10  }
  0x14   :  { %s1375_s15 = scalar_lea.hbm %s1761_s1, 512 }
  0x15   :  { %p1376_p8 = scmp.ne.s32.totalorder %s1761_s1, %s1375_s15  ;;  %p1379_p9 = scmp.lt.u32.totalorder %s1375_s15, %s1761_s1 }
  0x17   :  { %p1381_p10 = pnand %p1379_p9, %p1376_p8 }
  0x19   :  { %1384 = shalt.err (!%p1381_p10)
}
  0x1a   :  { %s1385_s20 = scalar_lea.vmem %s1493_s24, 512  ;;  %p1390_p12 = scmp.lt.s32.totalorder %s1493_s24, %s1493_s24 }
  0x1b   :  { %p1386_p11 = scmp.ne.s32.totalorder %s1493_s24, %s1385_s20  ;;  %p1391_p13 = scmp.lt.s32.totalorder %s1385_s20, %s1385_s20 }
  0x1d   :  { %p1392_p0 = por %p1391_p13, %p1390_p12 }
  0x1f   :  { %p1393_p1 = pnand %p1392_p0, %p1386_p11 }
  0x21   :  { %1396 = shalt.err (!%p1393_p1)
}
  0x22   :  { %27 = dma.hbm_to_vmem [thread:$0]  %s1761_s1, 512, %s1493_s24, [#allocation3], %s1449_s9, %s1449_s9, %s1450_s10  }
  0x23   :  { %s1451_s22 = smov [#allocation7]   ;;  %s1397_s27 = scalar_lea.hbm %s1764_s4, 256 }
  0x24   :  { %s47_s23 = sshll.u32 %s1451_s22, 4  ;;  %p1398_p2 = scmp.ne.s32.totalorder %s1764_s4, %s1397_s27  ;;  %s48_s23 = int_to_ptr.vmem [resolvable:$true] %s47_s23 }
  0x25   :  { %p1401_p3 = scmp.lt.u32.totalorder %s1397_s27, %s1764_s4 }
  0x27   :  { %p1403_p4 = pnand %p1401_p3, %p1398_p2 }
  0x29   :  { %1406 = shalt.err (!%p1403_p4)
}
  0x2a   :  { %s1407_s8 = scalar_lea.vmem %s48_s23, 256  ;;  %p1412_p6 = scmp.lt.s32.totalorder %s48_s23, %s48_s23 }
  0x2b   :  { %p1408_p5 = scmp.ne.s32.totalorder %s48_s23, %s1407_s8  ;;  %p1413_p7 = scmp.lt.s32.totalorder %s1407_s8, %s1407_s8 }
  0x2d   :  { %p1414_p8 = por %p1413_p7, %p1412_p6 }
  0x2f   :  { %p1415_p9 = pnand %p1414_p8, %p1408_p5 }
  0x31   :  { %1418 = shalt.err (!%p1415_p9)
}
  0x32   :  { %53 = dma.hbm_to_vmem [thread:$0]  %s1764_s4, 256, %s48_s23, [#allocation6], %s1449_s9, %s1449_s9, %s1450_s10  }
  0x33   :  { %1441 = dma.done.wait [#allocation3], 512  }
  0x34   :  { %1442 = vsyncadd [#allocation3], 4294966784 }
  0x35   :  { %1443 = dma.done.wait [#allocation6], 768  }
  0x36   :  { %1444 = vsyncadd [#allocation6], 4294966528  ;;  %v1452_v0 = vmov 0.0   ;;  %vm1453_vm0 = vmmov 0   ;;  %v1454_v1 = vmov 0   ;;  %v1554_v2 = vld [vmem:[%s1763_s3] sm:$0xff]   ;;  %v85_v29 = vlaneseq }
  0x37   :  { %1161 = vmatprep.subr.bf16.mxu0 %v1452_v0  ;;  %1165 = vmatprep.mubr.msk.bf16.mxu0 %vm1453_vm0, %v1452_v0  ;;  %v1559_v3 = vld [vmem:[%s1763_s3 + $0x8] sm:$0xff]   ;;  %v1562_v4 = vld [vmem:[#allocation7] sm:$0xff]   ;;  %v1566_v5 = vld [vmem:[#allocation7 + $0x8] sm:$0xff]   ;;  %s1455_s13 = smov 32   ;;  %vm107_vm3 = vcmask 261120  }
  0x38   :  { %1169 = vmatprep.subr.bf16.mxu1 %v1452_v0  ;;  %1173 = vmatprep.mubr.msk.bf16.mxu1 %vm1453_vm0, %v1452_v0  ;;  %v1585_v6 = vld [vmem:[#allocation2] sm:$0xff]   ;;  %v1591_v20 = vld [vmem:[%s1765_s5] ss:$0 sm:$0xff]  ;;  %v86_v30 = vand.u32 127, %v85_v29  ;;  %s1457_s5 = smov [#allocation8]  }
  0x39   :  { %1300 = vset.pattern.permute.xlu0 %v1454_v1  ;;  %1162 = vmatpush3.bf16.msra.mxu0 %v1554_v2  ;;  %v151_v7 = vunpack.c.l.bf16 %v1585_v6  ;;  %v1593_v21 = vld [vmem:[#allocation5] sm:$0xff]   ;;  %v81_v28 = vld [vmem:[%s1760_s0] sm:$0xff]  ;;  %s1456_s0 = smov 96   ;;  %v277_v58 = vunpack.c.h.bf16 %v1585_v6  ;;  %s1075_s16 = sshll.u32 %s1457_s5, 4  ;;  %s1076_s16 = int_to_ptr.vmem [resolvable:$true] %s1075_s16 }
  0x3a   :  { %1163 = vmatprep.subr.bf16.mxu0 %v1452_v0  ;;  %1170 = vmatpush3.bf16.msra.mxu1 %v1562_v4  ;;  %v159_v23 = vunpack.c.l.bf16 %v1593_v21  ;;  %vm87_vm1 = vcmp.lt.s32.totalorder %v86_v30, 16  ;;  %s1419_s17 = scalar_lea.vmem %s1076_s16, 128  ;;  %p1424_p11 = scmp.lt.s32.totalorder %s1076_s16, %s1076_s16 }
  0x3b   :  { %1171 = vmatprep.subr.bf16.mxu1 %v1452_v0  ;;  %v88_v31 = vsel %vm87_vm1, 1, %v1454_v1  ;;  %p1420_p10 = scmp.ne.s32.totalorder %s1076_s16, %s1419_s17  ;;  %p1425_p12 = scmp.lt.s32.totalorder %s1419_s17, %s1419_s17 }
  0x3c   :  { %v91_v32 = vmul.u32 2, %v88_v31  ;;  %v89_v33 = vsub.s32 1, %v88_v31 }
  0x3d   :  { %1164 = vmatpush3.bf16.msra.mxu0 %v1559_v3  ;;  %p1426_p13 = por %p1425_p12, %p1424_p11 }
  0x3e   :  { %1177 = vmatprep.subr.bf16.mxu0 %v1452_v0  ;;  %1172 = vmatpush3.bf16.msra.mxu1 %v1566_v5  ;;  %v1086_v34 = vadd.s32 4294967295, %v91_v32  ;;  %v90_v35 = vmul.u32 7, %v89_v33 }
  0x3f   :  { %1185 = vmatprep.subr.bf16.mxu1 %v1452_v0  ;;  %p1427_p0 = pnand %p1426_p13, %p1420_p10 }
  0x40   :  { %1166 = vmatmul.mubr.bf16.vlgmr.msra.gmra.mrb[0].mxu0 %v1454_v1  ;;  %v460_v36 = vmul.u32 2, %v1086_v34  ;;  %v580_v37 = vmul.u32 3, %v1086_v34  ;;  %v1601_v40 = vadd.s32 %v1086_v34, %v90_v35 }
  0x41   :  { %1178 = vmatpush3.bf16.msra.mxu0 %v1554_v2  ;;  %1181 = vmatprep.mubr.msk.bf16.mxu0 %vm1453_vm0, %v1452_v0  ;;  %v700_v38 = vmul.u32 4, %v1086_v34  ;;  %v820_v39 = vmul.u32 5, %v1086_v34 }
  0x42   :  { %1174 = vmatmul.mubr.bf16.vlgmr.msra.gmra.mrb[0].mxu1 %v1454_v1  ;;  %1179 = vmatprep.subr.bf16.mxu0 %v1452_v0  ;;  %v1603_v41 = vadd.s32 %v460_v36, %v90_v35  ;;  %v1605_v42 = vadd.s32 %v580_v37, %v90_v35  ;;  %v940_v43 = vmul.u32 6, %v1086_v34  ;;  %v1060_v46 = vmul.u32 7, %v1086_v34 }
  0x43   :  { %1186 = vmatpush3.bf16.msra.mxu1 %v1562_v4  ;;  %1189 = vmatprep.mubr.msk.bf16.mxu1 %vm1453_vm0, %v1452_v0  ;;  %v1607_v44 = vadd.s32 %v700_v38, %v90_v35  ;;  %v1609_v45 = vadd.s32 %v820_v39, %v90_v35 }
  0x44   :  { %1187 = vmatprep.subr.bf16.mxu1 %v1452_v0  ;;  %v1611_v47 = vadd.s32 %v940_v43, %v90_v35  ;;  %v1613_v48 = vadd.s32 %v1060_v46, %v90_v35  ;;  %v351_v46 = vld [vmem:[#allocation5 + $0x8] sm:$0xff]  }
  0x45   :  { %1180 = vmatpush3.bf16.msra.mxu0 %v1559_v3 }
  0x46   :  { %1193 = vmatprep.subr.bf16.mxu0 %v1452_v0 }
  0x47   :  { %1188 = vmatpush3.bf16.msra.mxu1 %v1566_v5 }
  0x48   :  { %1201 = vmatprep.subr.bf16.mxu1 %v1452_v0 }
 0x113   :  { %v145_v8 = vpop.f32.mrb[0].mxu0 }
 0x114   :  { %v152_v9 = vadd.f32 %v151_v7, %v145_v8  ;;  %v1167_v10 = vpop.f32.mrb[1].mxu0 }
 0x115   :  { %v148_v11 = vpop.f32.mrb[2].mxu0  ;;  %v206_v12 = vpop.f32.mrb[0].mxu1 }
 0x116   :  { %v1089_v13 = vmul.f32 -1.442695, %v152_v9  ;;  %v1168_v14 = vpop.f32.mrb[3].mxu0  ;;  %v1175_v15 = vpop.f32.mrb[1].mxu1  ;;  %v207_v22 = vadd.f32 %v1591_v20, %v206_v12 }
 0x117   :  { %v209_v16 = vpop.f32.mrb[2].mxu1 }
 0x118   :  { %1305 = vpow2.f32 %v1089_v13  ;;  %v1176_v17 = vpop.f32.mrb[3].mxu1  ;;  %v285_v13 = vunpack.c.h.bf16 %v1593_v21 }
 0x122   :  { %v1306_v18 = vpop.eup %1305 }
 0x123   :  { %v156_v19 = vadd.f32 1.0, %v1306_v18 }
 0x125   :  { %1307 = vrcp.f32 %v156_v19 }
 0x12f   :  { %v1308_v24 = vpop.eup %1307 }
 0x130   :  { %v212_v25 = vmul.f32 %v1308_v24, %v207_v22  ;;  %v215_v49 = vsub.f32 1.0, %v1308_v24  ;;  %v221_v52 = vmul.f32 0.0, %v1308_v24 }
 0x132   :  { %v213_v26 = vadd.f32 %v212_v25, %v159_v23 }
 0x134   :  { %1309 = vtanh.f32 %v213_v26 }
 0x13e   :  { %v1310_v27 = vpop.eup %1309 }
 0x13f   :  { %217 = vrot.lane.b32.xlu0 %v1310_v27, %s1455_s13 }
 0x143   :  { %83 = vperm.xlu0 %1300, %v81_v28   ;;  %v349_v28 = vld [vmem:[#allocation2 + $0x8] sm:$0xff]  }
 0x144   :  { %v396_v29 = vunpack.c.l.bf16 %v349_v28 }
 0x1b1   :  { %v218_v50 = vpop.permute.xlu0 %217 }
 0x1b2   :  { %v220_v51 = vmul.f32 %v218_v50, %v215_v49  ;;  %v404_v49 = vunpack.c.l.bf16 %v351_v46 }
 0x1b4   :  { %v222_v53 = vadd.f32 %v221_v52, %v220_v51 }
 0x1b6   :  { %225 = vrot.lane.b32.xlu1 %v222_v53, %s1456_s0 }
 0x1c2   :  { %v1616_v54 = vpop.permute.xlu0 %83 }
 0x1c3   :  { %vm223_vm2 = vcmp.lt.s32.totalorder %v90_v35, %v1616_v54  ;;  %vm342_vm4 = vcmp.lt.s32.totalorder %v1601_v40, %v1616_v54  ;;  %vm462_vm5 = vcmp.lt.s32.totalorder %v1603_v41, %v1616_v54  ;;  %v516_v41 = vunpack.c.h.bf16 %v349_v28 }
 0x1c4   :  { %vm582_vm6 = vcmp.lt.s32.totalorder %v1605_v42, %v1616_v54  ;;  %v589_v42 = vld [vmem:[#allocation2 + $0x10] sm:$0xff]   ;;  %vm702_vm7 = vcmp.lt.s32.totalorder %v1607_v44, %v1616_v54  ;;  %vm822_vm8 = vcmp.lt.s32.totalorder %v1609_v45, %v1616_v54  ;;  %v829_v45 = vld [vmem:[#allocation2 + $0x18] sm:$0xff]   ;;  %vm942_vm9 = vcmp.lt.s32.totalorder %v1611_v47, %v1616_v54 }
 0x1c5   :  { %v756_v44 = vunpack.c.h.bf16 %v589_v42  ;;  %vm1062_vm10 = vcmp.lt.s32.totalorder %v1613_v48, %v1616_v54 }
 0x228   :  { %v226_v55 = vpop.permute.xlu1 %225 }
 0x229   :  { %v228_v56 = vsel %vm223_vm2, %v226_v55, 0.0 }
 0x22a   :  { %v233_v57 = vpack.c.bf16 %v228_v56, %v228_v56 }
 0x22c   :  { %1182 = vmatmul.mubr.msk.bf16.vlgmr.msra.gmra.mrb[4].mxu0 %vm107_vm3, %v233_v57  ;;  %1190 = vmatmul.mubr.msk.bf16.vlgmr.msra.gmra.mrb[4].mxu1 %vm107_vm3, %v233_v57 }
 0x22d   :  { %1194 = vmatpush3.bf16.msra.mxu0 %v1554_v2  ;;  %1202 = vmatpush3.bf16.msra.mxu1 %v1562_v4 }
 0x22e   :  { %1195 = vmatprep.subr.bf16.mxu0 %v1452_v0  ;;  %1203 = vmatprep.subr.bf16.mxu1 %v1452_v0 }
 0x22f   :  { %1197 = vmatprep.mubr.msk.bf16.mxu0 %vm1453_vm0, %v1452_v0  ;;  %1205 = vmatprep.mubr.msk.bf16.mxu1 %vm1453_vm0, %v1452_v0 }
 0x231   :  { %1196 = vmatpush3.bf16.msra.mxu0 %v1559_v3  ;;  %1204 = vmatpush3.bf16.msra.mxu1 %v1566_v5 }
 0x232   :  { %1209 = vmatprep.subr.bf16.mxu0 %v1452_v0  ;;  %1217 = vmatprep.subr.bf16.mxu1 %v1452_v0 }
 0x2ff   :  { %v271_v59 = vpop.f32.mrb[4].mxu0  ;;  %v320_v60 = vpop.f32.mrb[4].mxu1 }
 0x300   :  { %v278_v61 = vadd.f32 %v277_v58, %v271_v59  ;;  %v1183_v62 = vpop.f32.mrb[5].mxu0  ;;  %v1191_v63 = vpop.f32.mrb[5].mxu1  ;;  %v321_v14 = vadd.f32 %v1591_v20, %v320_v60 }
 0x301   :  { %v274_v1 = vpop.f32.mrb[6].mxu0  ;;  %v323_v7 = vpop.f32.mrb[6].mxu1 }
 0x302   :  { %v1093_v8 = vmul.f32 -1.442695, %v278_v61  ;;  %v1184_v9 = vpop.f32.mrb[7].mxu0  ;;  %v1192_v10 = vpop.f32.mrb[7].mxu1 }
 0x304   :  { %1311 = vpow2.f32 %v1093_v8 }
 0x30e   :  { %v1312_v11 = vpop.eup %1311 }
 0x30f   :  { %v282_v12 = vadd.f32 1.0, %v1312_v11 }
 0x311   :  { %1313 = vrcp.f32 %v282_v12 }
 0x31b   :  { %v1314_v15 = vpop.eup %1313 }
 0x31c   :  { %v326_v6 = vmul.f32 %v1314_v15, %v321_v14  ;;  %v329_v19 = vsub.f32 1.0, %v1314_v15 }
 0x31e   :  { %v327_v16 = vadd.f32 %v326_v6, %v285_v13 }
 0x320   :  { %1315 = vtanh.f32 %v327_v16 }
 0x32a   :  { %v1316_v17 = vpop.eup %1315 }
 0x32b   :  { %331 = vrot.lane.b32.xlu1 %v1316_v17, %s1455_s13 }
 0x32f   :  { %336 = vrot.lane.b32.xlu1 %v228_v56, %s1455_s13 }
 0x39d   :  { %v332_v18 = vpop.permute.xlu1 %331 }
 0x39e   :  { %v334_v23 = vmul.f32 %v332_v18, %v329_v19  ;;  %v524_v18 = vunpack.c.h.bf16 %v351_v46 }
 0x3a1   :  { %v337_v22 = vpop.permute.xlu1 %336 }
 0x3a2   :  { %v339_v24 = vmul.f32 %v1314_v15, %v337_v22 }
 0x3a4   :  { %v340_v25 = vadd.f32 %v339_v24, %v334_v23 }
 0x3a6   :  { %344 = vrot.lane.b32.xlu0 %v340_v25, %s1456_s0 }
 0x418   :  { %v345_v21 = vpop.permute.xlu0 %344 }
 0x419   :  { %v347_v26 = vsel %vm342_vm4, %v345_v21, %v228_v56 }
 0x41a   :  { %455 = vrot.lane.b32.xlu0 %v347_v26, %s1455_s13  ;;  %v352_v27 = vpack.c.bf16 %v347_v26, %v347_v26 }
 0x41c   :  { %1198 = vmatmul.mubr.msk.bf16.vlgmr.msra.gmra.mrb[8].mxu0 %vm107_vm3, %v352_v27  ;;  %1206 = vmatmul.mubr.msk.bf16.vlgmr.msra.gmra.mrb[8].mxu1 %vm107_vm3, %v352_v27 }
 0x41d   :  { %1210 = vmatpush3.bf16.msra.mxu0 %v1554_v2  ;;  %1218 = vmatpush3.bf16.msra.mxu1 %v1562_v4 }
 0x41e   :  { %1211 = vmatprep.subr.bf16.mxu0 %v1452_v0  ;;  %1219 = vmatprep.subr.bf16.mxu1 %v1452_v0 }
 0x41f   :  { %1213 = vmatprep.mubr.msk.bf16.mxu0 %vm1453_vm0, %v1452_v0  ;;  %1221 = vmatprep.mubr.msk.bf16.mxu1 %vm1453_vm0, %v1452_v0 }
 0x421   :  { %1212 = vmatpush3.bf16.msra.mxu0 %v1559_v3  ;;  %1220 = vmatpush3.bf16.msra.mxu1 %v1566_v5 }
 0x422   :  { %1225 = vmatprep.subr.bf16.mxu0 %v1452_v0  ;;  %1233 = vmatprep.subr.bf16.mxu1 %v1452_v0 }
 0x48c   :  { %v456_v57 = vpop.permute.xlu0 %455 }
 0x4ef   :  { %v390_v30 = vpop.f32.mrb[8].mxu0  ;;  %v439_v31 = vpop.f32.mrb[8].mxu1 }
 0x4f0   :  { %v397_v32 = vadd.f32 %v396_v29, %v390_v30  ;;  %v1199_v33 = vpop.f32.mrb[9].mxu0  ;;  %v1207_v34 = vpop.f32.mrb[9].mxu1  ;;  %v440_v50 = vadd.f32 %v1591_v20, %v439_v31 }
 0x4f1   :  { %v393_v35 = vpop.f32.mrb[10].mxu0  ;;  %v442_v36 = vpop.f32.mrb[10].mxu1  ;;  %v636_v34 = vunpack.c.l.bf16 %v589_v42 }
 0x4f2   :  { %v1096_v37 = vmul.f32 -1.442695, %v397_v32  ;;  %v1200_v38 = vpop.f32.mrb[11].mxu0  ;;  %v1208_v39 = vpop.f32.mrb[11].mxu1 }
 0x4f4   :  { %1317 = vpow2.f32 %v1096_v37 }
 0x4fe   :  { %v1318_v40 = vpop.eup %1317 }
 0x4ff   :  { %v401_v43 = vadd.f32 1.0, %v1318_v40 }
 0x501   :  { %1319 = vrcp.f32 %v401_v43 }
 0x50b   :  { %v1320_v51 = vpop.eup %1319 }
 0x50c   :  { %v445_v52 = vmul.f32 %v1320_v51, %v440_v50  ;;  %v448_v56 = vsub.f32 1.0, %v1320_v51  ;;  %v458_v59 = vmul.f32 %v1320_v51, %v456_v57 }
 0x50e   :  { %v446_v53 = vadd.f32 %v445_v52, %v404_v49 }
 0x510   :  { %1321 = vtanh.f32 %v446_v53  ;;  %v591_v53 = vld [vmem:[#allocation5 + $0x10] sm:$0xff]  }
 0x51a   :  { %v1322_v55 = vpop.eup %1321 }
 0x51b   :  { %450 = vrot.lane.b32.xlu1 %v1322_v55, %s1455_s13  ;;  %v644_v55 = vunpack.c.l.bf16 %v591_v53 }
 0x58d   :  { %v451_v58 = vpop.permute.xlu1 %450 }
 0x58e   :  { %v453_v60 = vmul.f32 %v451_v58, %v448_v56 }
 0x590   :  { %v459_v61 = vadd.f32 %v458_v59, %v453_v60 }
 0x592   :  { %464 = vrot.lane.b32.xlu1 %v459_v61, %s1456_s0 }
 0x604   :  { %v465_v62 = vpop.permute.xlu1 %464 }
 0x605   :  { %v467_v63 = vsel %vm462_vm5, %v465_v62, %v347_v26 }
 0x606   :  { %575 = vrot.lane.b32.xlu1 %v467_v63, %s1455_s13  ;;  %v472_v1 = vpack.c.bf16 %v467_v63, %v467_v63 }
 0x608   :  { %1214 = vmatmul.mubr.msk.bf16.vlgmr.msra.gmra.mrb[12].mxu0 %vm107_vm3, %v472_v1  ;;  %1222 = vmatmul.mubr.msk.bf16.vlgmr.msra.gmra.mrb[12].mxu1 %vm107_vm3, %v472_v1 }
 0x609   :  { %1226 = vmatpush3.bf16.msra.mxu0 %v1554_v2  ;;  %1234 = vmatpush3.bf16.msra.mxu1 %v1562_v4 }
 0x60a   :  { %1227 = vmatprep.subr.bf16.mxu0 %v1452_v0  ;;  %1235 = vmatprep.subr.bf16.mxu1 %v1452_v0 }
 0x60b   :  { %1229 = vmatprep.mubr.msk.bf16.mxu0 %vm1453_vm0, %v1452_v0  ;;  %1237 = vmatprep.mubr.msk.bf16.mxu1 %vm1453_vm0, %v1452_v0 }
 0x60d   :  { %1228 = vmatpush3.bf16.msra.mxu0 %v1559_v3  ;;  %1236 = vmatpush3.bf16.msra.mxu1 %v1566_v5 }
 0x60e   :  { %1241 = vmatprep.subr.bf16.mxu0 %v1452_v0  ;;  %1249 = vmatprep.subr.bf16.mxu1 %v1452_v0 }
 0x678   :  { %v576_v26 = vpop.permute.xlu1 %575 }
 0x6db   :  { %v510_v7 = vpop.f32.mrb[12].mxu0  ;;  %v559_v8 = vpop.f32.mrb[12].mxu1 }
 0x6dc   :  { %v517_v9 = vadd.f32 %v516_v41, %v510_v7  ;;  %v1215_v10 = vpop.f32.mrb[13].mxu0  ;;  %v1223_v11 = vpop.f32.mrb[13].mxu1  ;;  %v560_v19 = vadd.f32 %v1591_v20, %v559_v8 }
 0x6dd   :  { %v513_v12 = vpop.f32.mrb[14].mxu0  ;;  %v562_v13 = vpop.f32.mrb[14].mxu1 }
 0x6de   :  { %v1099_v14 = vmul.f32 -1.442695, %v517_v9  ;;  %v1216_v15 = vpop.f32.mrb[15].mxu0  ;;  %v1224_v6 = vpop.f32.mrb[15].mxu1 }
 0x6e0   :  { %1323 = vpow2.f32 %v1099_v14 }
 0x6ea   :  { %v1324_v16 = vpop.eup %1323 }
 0x6eb   :  { %v521_v17 = vadd.f32 1.0, %v1324_v16 }
 0x6ed   :  { %1325 = vrcp.f32 %v521_v17 }
 0x6f7   :  { %v1326_v22 = vpop.eup %1325 }
 0x6f8   :  { %v565_v23 = vmul.f32 %v1326_v22, %v560_v19  ;;  %v568_v21 = vsub.f32 1.0, %v1326_v22  ;;  %v578_v28 = vmul.f32 %v1326_v22, %v576_v26 }
 0x6fa   :  { %v566_v24 = vadd.f32 %v565_v23, %v524_v18 }
 0x6fc   :  { %1327 = vtanh.f32 %v566_v24  ;;  %v764_v24 = vunpack.c.h.bf16 %v591_v53 }
 0x706   :  { %v1328_v25 = vpop.eup %1327 }
 0x707   :  { %570 = vrot.lane.b32.xlu0 %v1328_v25, %s1455_s13 }
 0x779   :  { %v571_v27 = vpop.permute.xlu0 %570 }
 0x77a   :  { %v573_v29 = vmul.f32 %v571_v27, %v568_v21 }
 0x77c   :  { %v579_v30 = vadd.f32 %v578_v28, %v573_v29 }
 0x77e   :  { %584 = vrot.lane.b32.xlu0 %v579_v30, %s1456_s0 }
 0x7f0   :  { %v585_v31 = vpop.permute.xlu0 %584 }
 0x7f1   :  { %v587_v32 = vsel %vm582_vm6, %v585_v31, %v467_v63 }
 0x7f2   :  { %695 = vrot.lane.b32.xlu0 %v587_v32, %s1455_s13  ;;  %v592_v33 = vpack.c.bf16 %v587_v32, %v587_v32 }
 0x7f4   :  { %1230 = vmatmul.mubr.msk.bf16.vlgmr.msra.gmra.mrb[16].mxu0 %vm107_vm3, %v592_v33  ;;  %1238 = vmatmul.mubr.msk.bf16.vlgmr.msra.gmra.mrb[16].mxu1 %vm107_vm3, %v592_v33 }
 0x7f5   :  { %1242 = vmatpush3.bf16.msra.mxu0 %v1554_v2  ;;  %1250 = vmatpush3.bf16.msra.mxu1 %v1562_v4 }
 0x7f6   :  { %1243 = vmatprep.subr.bf16.mxu0 %v1452_v0  ;;  %1251 = vmatprep.subr.bf16.mxu1 %v1452_v0 }
 0x7f7   :  { %1245 = vmatprep.mubr.msk.bf16.mxu0 %vm1453_vm0, %v1452_v0  ;;  %1253 = vmatprep.mubr.msk.bf16.mxu1 %vm1453_vm0, %v1452_v0 }
 0x7f9   :  { %1244 = vmatpush3.bf16.msra.mxu0 %v1559_v3  ;;  %1252 = vmatpush3.bf16.msra.mxu1 %v1566_v5 }
 0x7fa   :  { %1257 = vmatprep.subr.bf16.mxu0 %v1452_v0  ;;  %1265 = vmatprep.subr.bf16.mxu1 %v1452_v0 }
 0x864   :  { %v696_v62 = vpop.permute.xlu0 %695 }
 0x8c7   :  { %v630_v35 = vpop.f32.mrb[16].mxu0  ;;  %v679_v36 = vpop.f32.mrb[16].mxu1 }
 0x8c8   :  { %v637_v37 = vadd.f32 %v636_v34, %v630_v35  ;;  %v1231_v38 = vpop.f32.mrb[17].mxu0  ;;  %v1239_v39 = vpop.f32.mrb[17].mxu1  ;;  %v680_v56 = vadd.f32 %v1591_v20, %v679_v36 }
 0x8c9   :  { %v633_v40 = vpop.f32.mrb[18].mxu0  ;;  %v682_v43 = vpop.f32.mrb[18].mxu1 }
 0x8ca   :  { %v1102_v46 = vmul.f32 -1.442695, %v637_v37  ;;  %v1232_v49 = vpop.f32.mrb[19].mxu0  ;;  %v1240_v50 = vpop.f32.mrb[19].mxu1  ;;  %v876_v37 = vunpack.c.l.bf16 %v829_v45 }
 0x8cc   :  { %1329 = vpow2.f32 %v1102_v46 }
 0x8d6   :  { %v1330_v51 = vpop.eup %1329 }
 0x8d7   :  { %v641_v52 = vadd.f32 1.0, %v1330_v51 }
 0x8d9   :  { %1331 = vrcp.f32 %v641_v52 }
 0x8e3   :  { %v1332_v57 = vpop.eup %1331 }
 0x8e4   :  { %v685_v58 = vmul.f32 %v1332_v57, %v680_v56  ;;  %v688_v61 = vsub.f32 1.0, %v1332_v57  ;;  %v698_v1 = vmul.f32 %v1332_v57, %v696_v62 }
 0x8e6   :  { %v686_v59 = vadd.f32 %v685_v58, %v644_v55 }
 0x8e8   :  { %1333 = vtanh.f32 %v686_v59 }
 0x8f2   :  { %v1334_v60 = vpop.eup %1333 }
 0x8f3   :  { %690 = vrot.lane.b32.xlu1 %v1334_v60, %s1455_s13 }
 0x965   :  { %v691_v63 = vpop.permute.xlu1 %690 }
 0x966   :  { %v693_v41 = vmul.f32 %v691_v63, %v688_v61 }
 0x968   :  { %v699_v7 = vadd.f32 %v698_v1, %v693_v41 }
 0x96a   :  { %704 = vrot.lane.b32.xlu1 %v699_v7, %s1456_s0 }
 0x9dc   :  { %v705_v8 = vpop.permute.xlu1 %704 }
 0x9dd   :  { %v707_v9 = vsel %vm702_vm7, %v705_v8, %v587_v32 }
 0x9de   :  { %815 = vrot.lane.b32.xlu1 %v707_v9, %s1455_s13  ;;  %v712_v10 = vpack.c.bf16 %v707_v9, %v707_v9 }
 0x9e0   :  { %1246 = vmatmul.mubr.msk.bf16.vlgmr.msra.gmra.mrb[20].mxu0 %vm107_vm3, %v712_v10  ;;  %1254 = vmatmul.mubr.msk.bf16.vlgmr.msra.gmra.mrb[20].mxu1 %vm107_vm3, %v712_v10 }
 0x9e1   :  { %1258 = vmatpush3.bf16.msra.mxu0 %v1554_v2  ;;  %1266 = vmatpush3.bf16.msra.mxu1 %v1562_v4 }
 0x9e2   :  { %1259 = vmatprep.subr.bf16.mxu0 %v1452_v0  ;;  %1267 = vmatprep.subr.bf16.mxu1 %v1452_v0 }
 0x9e3   :  { %1261 = vmatprep.mubr.msk.bf16.mxu0 %vm1453_vm0, %v1452_v0  ;;  %1269 = vmatprep.mubr.msk.bf16.mxu1 %vm1453_vm0, %v1452_v0 }
 0x9e5   :  { %1260 = vmatpush3.bf16.msra.mxu0 %v1559_v3  ;;  %1268 = vmatpush3.bf16.msra.mxu1 %v1566_v5 }
 0x9e6   :  { %1273 = vmatprep.subr.bf16.mxu0 %v1452_v0  ;;  %1281 = vmatprep.subr.bf16.mxu1 %v1452_v0 }
 0xa50   :  { %v816_v30 = vpop.permute.xlu1 %815 }
 0xab3   :  { %v750_v11 = vpop.f32.mrb[20].mxu0  ;;  %v799_v12 = vpop.f32.mrb[20].mxu1 }
 0xab4   :  { %v757_v13 = vadd.f32 %v756_v44, %v750_v11  ;;  %v1247_v14 = vpop.f32.mrb[21].mxu0  ;;  %v1255_v15 = vpop.f32.mrb[21].mxu1  ;;  %v800_v25 = vadd.f32 %v1591_v20, %v799_v12 }
 0xab5   :  { %v753_v6 = vpop.f32.mrb[22].mxu0  ;;  %v802_v16 = vpop.f32.mrb[22].mxu1 }
 0xab6   :  { %v1105_v17 = vmul.f32 -1.442695, %v757_v13  ;;  %v1248_v18 = vpop.f32.mrb[23].mxu0  ;;  %v1256_v19 = vpop.f32.mrb[23].mxu1 }
 0xab8   :  { %1335 = vpow2.f32 %v1105_v17 }
 0xac2   :  { %v1336_v22 = vpop.eup %1335 }
 0xac3   :  { %v761_v23 = vadd.f32 1.0, %v1336_v22 }
 0xac5   :  { %1337 = vrcp.f32 %v761_v23 }
 0xacf   :  { %v1338_v21 = vpop.eup %1337 }
 0xad0   :  { %v805_v26 = vmul.f32 %v1338_v21, %v800_v25  ;;  %v808_v29 = vsub.f32 1.0, %v1338_v21  ;;  %v818_v32 = vmul.f32 %v1338_v21, %v816_v30 }
 0xad2   :  { %v806_v27 = vadd.f32 %v805_v26, %v764_v24 }
 0xad4   :  { %1339 = vtanh.f32 %v806_v27 }
 0xade   :  { %v1340_v28 = vpop.eup %1339 }
 0xadf   :  { %810 = vrot.lane.b32.xlu0 %v1340_v28, %s1455_s13 }
 0xb51   :  { %v811_v31 = vpop.permute.xlu0 %810 }
 0xb52   :  { %v813_v33 = vmul.f32 %v811_v31, %v808_v29 }
 0xb54   :  { %v819_v42 = vadd.f32 %v818_v32, %v813_v33 }
 0xb56   :  { %824 = vrot.lane.b32.xlu0 %v819_v42, %s1456_s0 }
 0xbc8   :  { %v825_v34 = vpop.permute.xlu0 %824 }
 0xbc9   :  { %v827_v35 = vsel %vm822_vm8, %v825_v34, %v707_v9  ;;  %v996_v9 = vunpack.c.h.bf16 %v829_v45 }
 0xbca   :  { %935 = vrot.lane.b32.xlu0 %v827_v35, %s1455_s13  ;;  %v832_v36 = vpack.c.bf16 %v827_v35, %v827_v35 }
 0xbcc   :  { %1262 = vmatmul.mubr.msk.bf16.vlgmr.msra.gmra.mrb[24].mxu0 %vm107_vm3, %v832_v36  ;;  %1270 = vmatmul.mubr.msk.bf16.vlgmr.msra.gmra.mrb[24].mxu1 %vm107_vm3, %v832_v36 }
 0xbcd   :  { %1274 = vmatpush3.bf16.msra.mxu0 %v1554_v2  ;;  %1282 = vmatpush3.bf16.msra.mxu1 %v1562_v4 }
 0xbce   :  { %1275 = vmatprep.subr.bf16.mxu0 %v1452_v0  ;;  %1283 = vmatprep.subr.bf16.mxu1 %v1452_v0 }
 0xbcf   :  { %1277 = vmatprep.mubr.msk.bf16.mxu0 %vm1453_vm0, %v1452_v0  ;;  %1285 = vmatprep.mubr.msk.bf16.mxu1 %vm1453_vm0, %v1452_v0  ;;  %v831_v0 = vld [vmem:[#allocation5 + $0x18] sm:$0xff]  }
 0xbd0   :  { %v1004_v19 = vunpack.c.h.bf16 %v831_v0 }
 0xbd1   :  { %1276 = vmatpush3.bf16.msra.mxu0 %v1559_v3  ;;  %1284 = vmatpush3.bf16.msra.mxu1 %v1566_v5  ;;  %v884_v3 = vunpack.c.l.bf16 %v831_v0 }
 0xc3c   :  { %v936_v60 = vpop.permute.xlu0 %935 }
 0xc9f   :  { %v870_v38 = vpop.f32.mrb[24].mxu0  ;;  %v919_v2 = vpop.f32.mrb[24].mxu1 }
 0xca0   :  { %v877_v39 = vadd.f32 %v876_v37, %v870_v38  ;;  %v1263_v4 = vpop.f32.mrb[25].mxu0  ;;  %v1271_v40 = vpop.f32.mrb[25].mxu1  ;;  %v920_v5 = vadd.f32 %v1591_v20, %v919_v2 }
 0xca1   :  { %v873_v43 = vpop.f32.mrb[26].mxu0  ;;  %v922_v46 = vpop.f32.mrb[26].mxu1 }
 0xca2   :  { %v1108_v49 = vmul.f32 -1.442695, %v877_v39  ;;  %v1264_v50 = vpop.f32.mrb[27].mxu0  ;;  %v1272_v51 = vpop.f32.mrb[27].mxu1 }
 0xca4   :  { %1341 = vpow2.f32 %v1108_v49 }
 0xcae   :  { %v1342_v52 = vpop.eup %1341 }
 0xcaf   :  { %v881_v53 = vadd.f32 1.0, %v1342_v52 }
 0xcb1   :  { %1343 = vrcp.f32 %v881_v53 }
 0xcbb   :  { %v1344_v55 = vpop.eup %1343 }
 0xcbc   :  { %v925_v56 = vmul.f32 %v1344_v55, %v920_v5  ;;  %v928_v59 = vsub.f32 1.0, %v1344_v55  ;;  %v938_v62 = vmul.f32 %v1344_v55, %v936_v60 }
 0xcbe   :  { %v926_v57 = vadd.f32 %v925_v56, %v884_v3 }
 0xcc0   :  { %1345 = vtanh.f32 %v926_v57 }
 0xcca   :  { %v1346_v58 = vpop.eup %1345 }
 0xccb   :  { %930 = vrot.lane.b32.xlu1 %v1346_v58, %s1455_s13 }
 0xd3d   :  { %v931_v61 = vpop.permute.xlu1 %930 }
 0xd3e   :  { %v933_v63 = vmul.f32 %v931_v61, %v928_v59 }
 0xd40   :  { %v939_v1 = vadd.f32 %v938_v62, %v933_v63 }
 0xd42   :  { %944 = vrot.lane.b32.xlu1 %v939_v1, %s1456_s0 }
 0xdb4   :  { %v945_v41 = vpop.permute.xlu1 %944 }
 0xdb5   :  { %v947_v7 = vsel %vm942_vm9, %v945_v41, %v827_v35 }
 0xdb6   :  { %1055 = vrot.lane.b32.xlu1 %v947_v7, %s1455_s13  ;;  %v952_v8 = vpack.c.bf16 %v947_v7, %v947_v7 }
 0xdb8   :  { %1278 = vmatmul.mubr.msk.bf16.vlgmr.msra.gmra.mrb[28].mxu0 %vm107_vm3, %v952_v8  ;;  %1286 = vmatmul.mubr.msk.bf16.vlgmr.msra.gmra.mrb[28].mxu1 %vm107_vm3, %v952_v8 }
 0xe28   :  { %v1056_v27 = vpop.permute.xlu1 %1055 }
 0xe8b   :  { %v990_v10 = vpop.f32.mrb[28].mxu0  ;;  %v1039_v44 = vpop.f32.mrb[28].mxu1 }
 0xe8c   :  { %v997_v11 = vadd.f32 %v996_v9, %v990_v10  ;;  %v1279_v12 = vpop.f32.mrb[29].mxu0  ;;  %v1287_v13 = vpop.f32.mrb[29].mxu1  ;;  %v1040_v22 = vadd.f32 %v1591_v20, %v1039_v44 }
 0xe8d   :  { %v993_v14 = vpop.f32.mrb[30].mxu0  ;;  %v1042_v15 = vpop.f32.mrb[30].mxu1 }
 0xe8e   :  { %v1111_v6 = vmul.f32 -1.442695, %v997_v11  ;;  %v1280_v16 = vpop.f32.mrb[31].mxu0  ;;  %v1288_v17 = vpop.f32.mrb[31].mxu1 }
 0xe90   :  { %1347 = vpow2.f32 %v1111_v6 }
 0xe9a   :  { %v1348_v47 = vpop.eup %1347 }
 0xe9b   :  { %v1001_v18 = vadd.f32 1.0, %v1348_v47 }
 0xe9d   :  { %1349 = vrcp.f32 %v1001_v18 }
 0xea7   :  { %v1350_v23 = vpop.eup %1349 }
 0xea8   :  { %v1045_v24 = vmul.f32 %v1350_v23, %v1040_v22  ;;  %v1048_v26 = vsub.f32 1.0, %v1350_v23  ;;  %v1058_v29 = vmul.f32 %v1350_v23, %v1056_v27 }
 0xeaa   :  { %v1046_v25 = vadd.f32 %v1045_v24, %v1004_v19 }
 0xeac   :  { %1351 = vtanh.f32 %v1046_v25 }
 0xeb6   :  { %v1352_v21 = vpop.eup %1351 }
 0xeb7   :  { %1050 = vrot.lane.b32.xlu0 %v1352_v21, %s1455_s13 }
 0xf29   :  { %v1051_v28 = vpop.permute.xlu0 %1050 }
 0xf2a   :  { %v1053_v30 = vmul.f32 %v1051_v28, %v1048_v26 }
 0xf2c   :  { %v1059_v31 = vadd.f32 %v1058_v29, %v1053_v30 }
 0xf2e   :  { %1064 = vrot.lane.b32.xlu0 %v1059_v31, %s1456_s0 }
 0xfa0   :  { %v1065_v20 = vpop.permute.xlu0 %1064 }
 0xfa1   :  { %v1067_v32 = vsel %vm1062_vm10, %v1065_v20, %v947_v7 }
 0xfa2   :  { %1068 = vst.msk [vmem:[#allocation8] sm:$0xff] %vm107_vm3, %v1067_v32 }
 0xfa3   :  { %1430 = shalt.err (!%p1427_p0)
}
 0xfa4   :  { %s1431_s20 = scalar_lea.hbm %s1766_s6, 128 }
 0xfa5   :  { %p1432_p1 = scmp.ne.s32.totalorder %s1766_s6, %s1431_s20  ;;  %p1435_p2 = scmp.lt.u32.totalorder %s1431_s20, %s1766_s6 }
 0xfa7   :  { %p1437_p3 = pnand %p1435_p2, %p1432_p1 }
 0xfa9   :  { %1440 = shalt.err (!%p1437_p3)
}
 0xfaa   :  { %1078 = dma.vmem_to_hbm [thread:$0]  %s1076_s16, 128, %s1766_s6, [#allocation4]  }
 0xfab   :  { %1445 = dma.done.wait [#allocation4], 128  }
 0xfac   :  { %1446 = vsyncadd [#allocation4], 4294967168 }
 0xfad   :  { %1082 = vsyncpa [#allocation3], 1 }
 0xfae   :  { %1083 = vsyncpa [#allocation6], 1 }
 0xfaf   :  { %1084 = vsyncpa [#allocation4], 1 }

</bundles_post_ra>
